<compile_context>
chip_gen: v5e
topology: v5e:2x2
jax: 0.10.0
libtpu: 0.0.40
codegen_flags: <defaults>
</compile_context>

<pallas_src>
import functools
import math

import numpy as np
import jax
import jax.numpy as jnp
from jax.experimental import pallas as pl
from jax.experimental.pallas import tpu as pltpu

BN_EPS = 1e-5
BN_SCALE = float(1.0 / math.sqrt(1.0 + BN_EPS))  # gamma/sqrt(var+eps) with defaults
FEATS = [64, 128, 256, 512, 1024]


def _vmem_limit_bytes():
    # generation-aware: ~half of physical VMEM, capped at 64 MiB (v5e/v6e 128 MiB,
    # v7x 64 MiB per TensorCore).
    try:
        cap = int(pltpu.get_tpu_info().vmem_capacity_bytes)
    except Exception:
        cap = 64 * 1024 * 1024
    return int(max(16 * 1024 * 1024, min(cap // 2, 64 * 1024 * 1024)))


_VMEM_LIMIT = _vmem_limit_bytes()


# ------------------------------------------------------------------------------
# Tiling plans (shared between init-time weight padding and call-time A padding)
# ------------------------------------------------------------------------------
def _round_up(x, m):
    return ((x + m - 1) // m) * m


def _plan_m(M):
    if M <= 256:
        Mp = _round_up(M, 16)          # 16: bf16 sublane packing
        return Mp, Mp
    Mp = _round_up(M, 128)
    bm = 256 if Mp % 256 == 0 else 128
    return Mp, bm


def _plan_k(K):
    Kp = _round_up(K, 128)
    if Kp <= 8192:
        return Kp, Kp                  # single reduction step
    for bk in (2048, 1536, 1024, 768, 512, 384, 256):
        if Kp % bk == 0:
            return Kp, bk
    return _round_up(K, 512), 512


def _plan_n(N):
    Np = _round_up(N, 128)
    bn = 256 if Np % 256 == 0 else 128
    return Np, bn


def _epilogue(y, act):
    if act == "relu":
        return jnp.maximum(y, 0.0)
    if act == "sigmoid":
        return jax.nn.sigmoid(y)
    return y


# ------------------------------------------------------------------------------
# Fused Pallas matmul kernels:  out = act(A @ B + bias)   (BN folded into B/bias)
#   A, B are bf16 tiles (MXU), accumulation + epilogue in f32, bf16 store.
# ------------------------------------------------------------------------------
def _mm_kernel_single(act, bn):
    def kernel(a_ref, b_ref, t_ref, o_ref):
        off = pl.multiple_of(pl.program_id(1) * bn, bn)
        y = jnp.dot(a_ref[...], b_ref[...], preferred_element_type=jnp.float32)
        y = y + t_ref[:, pl.ds(off, bn)]
        o_ref[...] = _epilogue(y, act).astype(o_ref.dtype)
    return kernel


def _mm_kernel_multi(act, bn):
    def kernel(a_ref, b_ref, t_ref, o_ref, acc_ref):
        @pl.when(pl.program_id(2) == 0)
        def _():
            acc_ref[...] = jnp.zeros_like(acc_ref)

        acc_ref[...] += jnp.dot(a_ref[...], b_ref[...],
                                preferred_element_type=jnp.float32)

        @pl.when(pl.program_id(2) == pl.num_programs(2) - 1)
        def _():
            off = pl.multiple_of(pl.program_id(1) * bn, bn)
            y = acc_ref[...] + t_ref[:, pl.ds(off, bn)]
            o_ref[...] = _epilogue(y, act).astype(o_ref.dtype)
    return kernel


@functools.partial(jax.jit, static_argnames=("act", "n_out"))
def matmul_fused(a, b_p, t_p, *, act, n_out):
    """a:(M,K) activations; b_p:(Kp,Np) bf16 pre-padded/scaled weight; t_p:(1,Np) bias.

    Returns act(a @ b + bias)[:M, :n_out] in bf16 (f32 accumulation)."""
    M, K = a.shape
    Kp, bk = _plan_k(K)
    Kp_b, Np = b_p.shape
    assert Kp_b == Kp, (K, Kp, Kp_b)
    Mp, bm = _plan_m(M)
    bn = 256 if Np % 256 == 0 else 128

    a_b = a.astype(jnp.bfloat16)
    if (Mp, Kp) != (M, K):
        a_b = jnp.pad(a_b, ((0, Mp - M), (0, Kp - K)))

    if bk == Kp:
        out = pl.pallas_call(
            _mm_kernel_single(act, bn),
            out_shape=jax.ShapeDtypeStruct((Mp, Np), jnp.bfloat16),
            grid_spec=pltpu.PrefetchScalarGridSpec(
                num_scalar_prefetch=0,
                grid=(Mp // bm, Np // bn),
                in_specs=[
                    pl.BlockSpec((bm, Kp), lambda i, j: (i, 0)),
                    pl.BlockSpec((Kp, bn), lambda i, j: (0, j)),
                    pl.BlockSpec((1, Np), lambda i, j: (0, 0)),   # resident bias
                ],
                out_specs=pl.BlockSpec((bm, bn), lambda i, j: (i, j))),
            compiler_params=pltpu.CompilerParams(
                dimension_semantics=("parallel", "parallel"),
                vmem_limit_bytes=_VMEM_LIMIT),
        )(a_b, b_p, t_p)
    else:
        out = pl.pallas_call(
            _mm_kernel_multi(act, bn),
            out_shape=jax.ShapeDtypeStruct((Mp, Np), jnp.bfloat16),
            grid_spec=pltpu.PrefetchScalarGridSpec(
                num_scalar_prefetch=0,
                grid=(Mp // bm, Np // bn, Kp // bk),
                in_specs=[
                    pl.BlockSpec((bm, bk), lambda i, j, k: (i, k)),
                    pl.BlockSpec((bk, bn), lambda i, j, k: (k, j)),
                    pl.BlockSpec((1, Np), lambda i, j, k: (0, 0)),
                ],
                out_specs=pl.BlockSpec((bm, bn), lambda i, j, k: (i, j)),
                scratch_shapes=[pltpu.VMEM((bm, bn), jnp.float32)]),
            compiler_params=pltpu.CompilerParams(
                dimension_semantics=("parallel", "parallel", "arbitrary"),
                vmem_limit_bytes=_VMEM_LIMIT),
        )(a_b, b_p, t_p)

    if (M, n_out) != (Mp, Np):
        out = out[:M, :n_out]
    return out


# ------------------------------------------------------------------------------
# Fused 3x3 conv kernel (any dilation, padding == dilation): in-kernel im2col.
# The zero-padded activation is row-flattened to (Hp*Wp, C); each of the 9 taps is
# then a contiguous row-slice of that slab (offset dy*dil*Wp + dx*dil), so no HBM
# patch materialization.  Outputs over the padded width, cropped in the wrapper.
# ------------------------------------------------------------------------------
def _conv3_kernel(offsets, M, bn, act):
    def kernel(x_ref, w_ref, t_ref, o_ref, xf_ref, acc_ref):
        # stage the (resident) activation block to f32 once per image
        @pl.when(pl.program_id(1) == 0)
        def _():
            xf_ref[...] = x_ref[0].astype(jnp.float32)

        a0 = xf_ref[offsets[0]:offsets[0] + M, :].astype(jnp.bfloat16)
        acc_ref[...] = jnp.dot(a0, w_ref[0], preferred_element_type=jnp.float32)
        for t in range(1, 9):
            a = xf_ref[offsets[t]:offsets[t] + M, :].astype(jnp.bfloat16)
            acc_ref[...] += jnp.dot(a, w_ref[t],
                                    preferred_element_type=jnp.float32)

        off = pl.multiple_of(pl.program_id(1) * bn, bn)
        y = acc_ref[...] + t_ref[:, pl.ds(off, bn)]
        o_ref[0] = _epilogue(y, act).astype(o_ref.dtype)
    return kernel


@functools.partial(jax.jit, static_argnames=("dil", "act", "n_out"))
def conv3x3_fused(x, w3, t_p, *, dil, act, n_out):
    """3x3 'same' conv (pad=dil, dilation=dil).

    x:(N,H,W,C); w3:(9,C,Np) bf16 pre-scaled weight; t_p:(1,Np) f32 bias row."""
    N, H, W, C = x.shape
    Np = w3.shape[2]
    bn = 256 if Np % 256 == 0 else 128
    Hp, Wp = H + 2 * dil, W + 2 * dil
    M = H * Wp                       # output over padded width, cropped later
    R = Hp * Wp + 2 * dil            # extra rows so every tap slice stays in-bounds

    xpad = jnp.pad(x.astype(jnp.bfloat16),
                   ((0, 0), (dil, dil), (dil, dil), (0, 0)))
    xflat = xpad.reshape(N, Hp * Wp, C)
    xflat = jnp.pad(xflat, ((0, 0), (0, 2 * dil), (0, 0)))

    offsets = tuple(dy * dil * Wp + dx * dil
                    for dy in range(3) for dx in range(3))

    out = pl.pallas_call(
        _conv3_kernel(offsets, M, bn, act),
        out_shape=jax.ShapeDtypeStruct((N, M, Np), jnp.bfloat16),
        grid_spec=pltpu.PrefetchScalarGridSpec(
            num_scalar_prefetch=0,
            grid=(N, Np // bn),
            in_specs=[
                pl.BlockSpec((1, R, C), lambda n, j: (n, 0, 0)),
                pl.BlockSpec((9, C, bn), lambda n, j: (0, 0, j)),
                pl.BlockSpec((1, Np), lambda n, j: (0, 0)),      # resident bias
            ],
            out_specs=pl.BlockSpec((1, M, bn), lambda n, j: (n, 0, j)),
            scratch_shapes=[pltpu.VMEM((R, C), jnp.float32),
                            pltpu.VMEM((M, bn), jnp.float32)]),
        compiler_params=pltpu.CompilerParams(
            dimension_semantics=("parallel", "parallel"),
            vmem_limit_bytes=_VMEM_LIMIT),
    )(xflat, w3, t_p)

    return out.reshape(N, H, Wp, Np)[:, :, :W, :n_out]


# ------------------------------------------------------------------------------
# True depthwise 3x3 conv (pad=1) as a Pallas VPU kernel (9 shifted madds/channel).
#   x:(N,H,W,C), w:(G,9,C), b:(G,C) -> G bf16 outputs (concatenated on channels).
# ------------------------------------------------------------------------------
@jax.jit
def depthwise3x3(x, w, b):
    N, H, W, C = x.shape
    G = w.shape[0]
    xpad = jnp.pad(x.astype(jnp.float32), ((0, 0), (1, 1), (1, 1), (0, 0)))
    Hp, Wp = H + 2, W + 2

    def kernel(x_ref, w_ref, b_ref, *o_refs):
        for g in range(G):
            acc = None
            for t in range(9):
                dy, dx = t // 3, t % 3
                wt = w_ref[g, t:t + 1, :]                        # (1, C)
                term = x_ref[0, dy:dy + H, dx:dx + W, :] * wt    # (H, W, C)
                acc = term if acc is None else acc + term
            o_refs[g][0] = (acc + b_ref[g:g + 1, :]).astype(jnp.bfloat16)

    outs = pl.pallas_call(
        kernel,
        out_shape=tuple(jax.ShapeDtypeStruct((N, H, W, C), jnp.bfloat16)
                        for _ in range(G)),
        grid_spec=pltpu.PrefetchScalarGridSpec(
            num_scalar_prefetch=0,
            grid=(N,),
            in_specs=[
                pl.BlockSpec((1, Hp, Wp, C), lambda n: (n, 0, 0, 0)),
                pl.BlockSpec((G, 9, C), lambda n: (0, 0, 0)),
                pl.BlockSpec((G, C), lambda n: (0, 0)),
            ],
            out_specs=[pl.BlockSpec((1, H, W, C), lambda n: (n, 0, 0, 0))
                       for _ in range(G)]),
        compiler_params=pltpu.CompilerParams(
            dimension_semantics=("parallel",),
            vmem_limit_bytes=_VMEM_LIMIT),
    )(xpad, w.astype(jnp.float32), b.astype(jnp.float32))
    outs = outs if isinstance(outs, (tuple, list)) else (outs,)
    return outs[0] if G == 1 else jnp.concatenate(outs, axis=-1)


# ------------------------------------------------------------------------------
# Conv dispatcher.  1x1 -> direct matmul; 3x3 (cin>=32) -> fused in-kernel im2col;
# tiny cin=1 multiscale 3x3/5x5/7x7 -> im2col glue + matmul.
# ------------------------------------------------------------------------------
def im2col(x, k, pad, dil):
    n, h, w, c = x.shape
    ho = h + 2 * pad - dil * (k - 1)
    wo = w + 2 * pad - dil * (k - 1)
    xp = jnp.pad(x, ((0, 0), (pad, pad), (pad, pad), (0, 0)))
    cols = []
    for ky in range(k):
        for kx in range(k):
            cols.append(xp[:, ky * dil:ky * dil + ho, kx * dil:kx * dil + wo, :])
    patches = jnp.concatenate(cols, axis=-1)
    return patches.reshape(n * ho * wo, k * k * c), (n, ho, wo)


def conv(x, p, pad=0, dil=1, act="none"):
    n, h, w, c = x.shape
    if p["k"] == 1:
        y = matmul_fused(x.reshape(n * h * w, c), p["wp"], p["tp"],
                         act=act, n_out=p["cout"])
        return y.reshape(n, h, w, p["cout"])
    if "w3" in p:
        assert pad == dil
        return conv3x3_fused(x, p["w3"], p["tp"], dil=dil, act=act,
                             n_out=p["cout"])
    patches, (n, ho, wo) = im2col(x, p["k"], pad, dil)
    y = matmul_fused(patches, p["wp"], p["tp"], act=act, n_out=p["cout"])
    return y.reshape(n, ho, wo, p["cout"])


def conv1x1_jax(x, w, b, act="none"):
    # Tiny-Cout (e.g. 1) 1x1 convs: plain VPU reduction (MXU would waste 127/128 lanes).
    y = jnp.tensordot(x.astype(jnp.float32), w, axes=([3], [0])) + b
    if act == "relu":
        y = jnp.maximum(y, 0.0)
    elif act == "sigmoid":
        y = jax.nn.sigmoid(y)
    return y


# ------------------------------------------------------------------------------
# Plain-JAX glue (pooling / static-stencil bilinear / group-norm)
# ------------------------------------------------------------------------------
def maxpool2(x):
    n, h, w, c = x.shape
    return jnp.max(x.reshape(n, h // 2, 2, w // 2, 2, c), axis=(2, 4))


def _interp_matrix(src, dst):
    # align_corners=True linear interpolation matrix (dst, src), built in numpy.
    m = np.zeros((dst, src), np.float32)
    if src == 1 or dst == 1:
        m[:, 0] = 1.0
        return m
    pos = np.arange(dst, dtype=np.float64) * (src - 1) / (dst - 1)
    i0 = np.minimum(np.floor(pos).astype(np.int64), src - 1)
    i1 = np.minimum(i0 + 1, src - 1)
    frac = (pos - i0).astype(np.float32)
    m[np.arange(dst), i0] += 1.0 - frac
    m[np.arange(dst), i1] += frac
    return m


def bilinear_resize(x, oh, ow):
    # gather-free bilinear (align_corners=True): two small static matmuls.
    n, h, w, c = x.shape
    if (h, w) == (oh, ow):
        return x
    dt = x.dtype
    y = x.astype(jnp.float32)
    if oh != h:
        mh = jnp.asarray(_interp_matrix(h, oh))
        y = jnp.einsum('oh,nhwc->nowc', mh, y)
    if ow != w:
        mw = jnp.asarray(_interp_matrix(w, ow))
        y = jnp.einsum('pw,nhwc->nhpc', mw, y)
    return y.astype(dt)


def group_norm(x, groups, eps=1e-5):
    n, h, w, c = x.shape
    xr = x.astype(jnp.float32).reshape(n, h * w, groups, c // groups)
    mean = xr.mean(axis=(1, 3), keepdims=True)
    var = ((xr - mean) ** 2).mean(axis=(1, 3), keepdims=True)
    return ((xr - mean) / jnp.sqrt(var + eps)).reshape(n, h, w, c)


# ------------------------------------------------------------------------------
# Deterministic parameter init.  BN scale folded; weights pre-padded/cast to bf16.
# ------------------------------------------------------------------------------
class _Key:
    key = jax.random.PRNGKey(0)


def rnd(shape, std):
    _Key.key, sub = jax.random.split(_Key.key)
    return jax.random.normal(sub, shape, jnp.float32) * std


def prep_conv(w, b, k, cin):
    """w:(k*k*cin, cout) raw weight (already BN-scaled), b:(cout,) bias."""
    Kdim, N = w.shape
    Np, _ = _plan_n(N)
    tp = jnp.zeros((1, Np), jnp.float32).at[0, :N].set(b.astype(jnp.float32))
    p = {"k": k, "cout": N, "tp": tp}
    if k == 3 and cin >= 32:
        w3 = jnp.zeros((9, cin, Np), jnp.bfloat16)
        p["w3"] = w3.at[:, :, :N].set(w.reshape(9, cin, N).astype(jnp.bfloat16))
    else:
        Kp, _ = _plan_k(Kdim)
        wp = jnp.zeros((Kp, Np), jnp.bfloat16)
        p["wp"] = wp.at[:Kdim, :N].set(w.astype(jnp.bfloat16))
    return p


def conv_p(cin, cout, k, bias=True, scale=1.0):
    fan = k * k * cin
    w = rnd((fan, cout), 1.0 / math.sqrt(fan)) * scale
    b = (rnd((cout,), 0.01) if bias else jnp.zeros((cout,), jnp.float32)) * scale
    return prep_conv(w, b, k, cin)


def linear_p(cin, cout):
    return prep_conv(rnd((cin, cout), 1.0 / math.sqrt(cin)),
                     jnp.zeros((cout,), jnp.float32), 1, cin)


def small_p(cin, cout, scale=1.0):
    return {"w": rnd((cin, cout), 1.0 / math.sqrt(cin)) * scale,
            "b": rnd((cout,), 0.01) * scale}


def dw_p(c):
    return {"w": rnd((1, 9, c), 1.0 / 3.0), "b": rnd((1, c), 0.01)}


def init_multiscale(cin, cout):
    # MultiscaleConv's own BN and the following init_conv BN are both folded here
    # (ReLU(s2*ReLU(s1*z)) == ReLU(s1*s2*z) for positive scales).
    s = BN_SCALE * BN_SCALE
    return {"c1": conv_p(cin, cout // 4, 1, scale=s),
            "c3": conv_p(cin, cout // 4, 3, scale=s),
            "c5": conv_p(cin, cout // 4, 5, scale=s),
            "c7": conv_p(cin, cout // 4, 7, scale=s)}


def init_edge(c):
    sob_h = jnp.array([[-1, 0, 1], [-2, 0, 2], [-1, 0, 1]], jnp.float32)
    sob_v = jnp.array([[-1, -2, -1], [0, 0, 0], [1, 2, 1]], jnp.float32)
    wh = jnp.broadcast_to(sob_h.reshape(9, 1), (9, c))
    wv = jnp.broadcast_to(sob_v.reshape(9, 1), (9, c))
    return {"dw_w": jnp.stack([wh, wv], axis=0),        # (2,9,C)
            "dw_b": jnp.zeros((2, c), jnp.float32),
            "ec": conv_p(2 * c, c, 1, scale=BN_SCALE)}


def init_se(c, red=4):
    return {"fc1": linear_p(2 * c, c // red), "fc2": linear_p(c // red, c)}


def init_seres(c):
    return {"c1": conv_p(c, c, 3, scale=BN_SCALE),
            "c2": conv_p(c, c, 3, scale=BN_SCALE),
            "se": init_se(c),
            "ee_dw": dw_p(c),
            "ee_pw": conv_p(c, c, 1, scale=BN_SCALE)}


def init_aspp(cin, cout):
    return {"a0": conv_p(cin, cout, 1, bias=False, scale=BN_SCALE),
            "a1": conv_p(cin, cout, 3, bias=False, scale=BN_SCALE),
            "a2": conv_p(cin, cout, 3, bias=False, scale=BN_SCALE),
            "a3": conv_p(cin, cout, 3, bias=False, scale=BN_SCALE),
            "a4": conv_p(cin, cout, 3, bias=False, scale=BN_SCALE),
            "gap": conv_p(cin, cout, 1, bias=False),            # GroupNorm, not BN
            "proj": conv_p(cout * 6, cout, 1, bias=False, scale=BN_SCALE)}


def init_att(fg, fl, fint):
    return {"wg": conv_p(fg, fint, 1, scale=BN_SCALE),
            "wx": conv_p(fl, fint, 1, scale=BN_SCALE),
            "psi": small_p(fint, 1, scale=BN_SCALE)}


def init_down(cin, cout):
    return {"c1": conv_p(cin, cout, 3, scale=BN_SCALE),
            "c2": conv_p(cout, cout, 3, scale=BN_SCALE)}


def init_up(cin, cout):
    return {"c": conv_p(cin, cout, 3, scale=BN_SCALE)}


def init_after_up(c):
    return {"c": conv_p(2 * c, c, 3, scale=BN_SCALE), "seres": init_seres(c)}


def init_stressnet(in_ch=1, out_ch=1):
    f = FEATS
    return {
        "msc": init_multiscale(in_ch, f[0]),
        "init_c": conv_p(f[0], f[0], 3, scale=BN_SCALE),
        "edge": init_edge(f[0]),
        "down1": init_down(f[0], f[1]), "down2": init_down(f[1], f[2]),
        "down3": init_down(f[2], f[3]), "down4": init_down(f[3], f[4]),
        "seres": [init_seres(f[4]) for _ in range(6)],
        "aspp": init_aspp(f[4], f[4]),
        "up1": init_up(f[4], f[3]), "au1": init_after_up(f[3]),
        "att1": init_att(f[3], f[3], f[3] // 2),
        "up2": init_up(f[3], f[2]), "au2": init_after_up(f[2]),
        "att2": init_att(f[2], f[2], f[2] // 2),
        "up3": init_up(f[2], f[1]), "au3": init_after_up(f[1]),
        "att3": init_att(f[1], f[1], f[1] // 2),
        "up4": init_up(f[1], f[0]), "au4": init_after_up(f[0]),
        "att4": init_att(f[0], f[0], f[0] // 2),
        # final[0] (64->64) and detail_branch[0] (64->64) share the same 3x3 taps
        # of u4 -> fused along the output-channel axis into one conv.
        "head0": conv_p(f[0], 2 * f[0], 3, scale=BN_SCALE),
        "final1": conv_p(f[0], 32, 3, scale=BN_SCALE),
        "final2": conv_p(32, 32, 3, scale=BN_SCALE),
        "final3": small_p(32, out_ch),
        "detail1": conv_p(f[0], 32, 3, scale=BN_SCALE),
        "detail2": small_p(32, out_ch),
        "edge_detail": {"edge": init_edge(f[0]),
                        "c1": conv_p(f[0], 32, 3, scale=BN_SCALE),
                        "c2": small_p(32, out_ch)},
    }


# ------------------------------------------------------------------------------
# Module forwards (all heavy conv/linear FLOPs go through the Pallas kernels)
# ------------------------------------------------------------------------------
def multiscale_fwd(x, p):
    o1 = conv(x, p["c1"])
    o3 = conv(x, p["c3"], pad=1)
    o5 = conv(x, p["c5"], pad=2)
    o7 = conv(x, p["c7"], pad=3)
    # both BNs (module + following init_conv BN) are folded into the weights
    return jnp.maximum(jnp.concatenate([o1, o3, o5, o7], axis=-1), 0.0)


def edge_fwd(x, p):
    e = depthwise3x3(x, p["dw_w"], p["dw_b"])     # [sobel_h | sobel_v] on channels
    return conv(e, p["ec"], act="relu")


def se_fwd(x, p):
    xf = x.astype(jnp.float32)
    avg = jnp.mean(xf, axis=(1, 2))
    mx = jnp.max(xf, axis=(1, 2))
    y = jnp.concatenate([avg, mx], axis=1)
    y = matmul_fused(y, p["fc1"]["wp"], p["fc1"]["tp"], act="relu",
                     n_out=p["fc1"]["cout"])
    y = matmul_fused(y, p["fc2"]["wp"], p["fc2"]["tp"], act="sigmoid",
                     n_out=p["fc2"]["cout"])
    return x * y[:, None, None, :]


def seres_fwd(x, p, dil=1):
    res = x
    out = conv(x, p["c1"], pad=dil, dil=dil, act="relu")
    out = conv(out, p["c2"], pad=dil, dil=dil, act="none")
    out = se_fwd(out, p["se"])
    edge = depthwise3x3(out, p["ee_dw"]["w"], p["ee_dw"]["b"])
    edge = conv(edge, p["ee_pw"], act="relu")
    return jnp.maximum(out + edge + res, 0.0)


def aspp_fwd(x, p):
    n, h, w, c = x.shape
    x0 = conv(x, p["a0"], act="relu")
    x1 = conv(x, p["a1"], pad=4, dil=4, act="relu")
    x2 = conv(x, p["a2"], pad=8, dil=8, act="relu")
    x3 = conv(x, p["a3"], pad=12, dil=12, act="relu")
    x4 = conv(x, p["a4"], pad=16, dil=16, act="relu")
    g = jnp.mean(x.astype(jnp.float32), axis=(1, 2), keepdims=True)
    g = conv(g.astype(jnp.bfloat16), p["gap"], act="none")
    g = jnp.maximum(group_norm(g, 16), 0.0)
    g = bilinear_resize(g, h, w).astype(jnp.bfloat16)
    cat = jnp.concatenate([x0, x1, x2, x3, x4, g], axis=-1)
    return conv(cat, p["proj"], act="relu")


def att_fwd(g, x, p):
    g1 = conv(g, p["wg"], act="none")
    x1 = conv(x, p["wx"], act="none")
    psi = jnp.maximum(g1 + x1, 0.0)
    psi = conv1x1_jax(psi, p["psi"]["w"], p["psi"]["b"], act="sigmoid")
    return x * psi.astype(jnp.bfloat16)


def down_fwd(x, p):
    x = conv(x, p["c1"], pad=1, act="relu")
    x = conv(x, p["c2"], pad=1, act="relu")
    return maxpool2(x)


def up_fwd(x, p):
    n, h, w, c = x.shape
    x = bilinear_resize(x, 2 * h, 2 * w)
    return conv(x, p["c"], pad=1, act="relu")


def after_up_fwd(x, p):
    x = conv(x, p["c"], pad=1, act="relu")
    return seres_fwd(x, p["seres"], dil=1)


def stressnet_fwd(x_nchw, p):
    x = jnp.transpose(x_nchw, (0, 2, 3, 1)).astype(jnp.bfloat16)  # NCHW -> NHWC

    d0 = multiscale_fwd(x, p["msc"])
    d0 = conv(d0, p["init_c"], pad=1, act="relu")
    d0 = d0 + edge_fwd(d0, p["edge"])
    skip1 = d0
    d1 = down_fwd(d0, p["down1"]); skip2 = d1
    d2 = down_fwd(d1, p["down2"]); skip3 = d2
    d3 = down_fwd(d2, p["down3"]); skip4 = d3
    d4 = down_fwd(d3, p["down4"])

    for sp, dl in zip(p["seres"], [1, 2, 4, 8, 16, 1]):
        d4 = seres_fwd(d4, sp, dil=dl)
    d4 = aspp_fwd(d4, p["aspp"])

    u1 = up_fwd(d4, p["up1"])
    u1 = after_up_fwd(jnp.concatenate([u1, att_fwd(u1, skip4, p["att1"])], -1), p["au1"])
    u2 = up_fwd(u1, p["up2"])
    u2 = after_up_fwd(jnp.concatenate([u2, att_fwd(u2, skip3, p["att2"])], -1), p["au2"])
    u3 = up_fwd(u2, p["up3"])
    u3 = after_up_fwd(jnp.concatenate([u3, att_fwd(u3, skip2, p["att3"])], -1), p["au3"])
    u4 = up_fwd(u3, p["up4"])
    u4 = after_up_fwd(jnp.concatenate([u4, att_fwd(u4, skip1, p["att4"])], -1), p["au4"])

    # heads: final[0] and detail[0] fused along the output-channel axis
    hm = conv(u4, p["head0"], pad=1, act="relu")       # (N,H,W,128)
    m = hm[..., :FEATS[0]]
    dtl = hm[..., FEATS[0]:]

    m = conv(m, p["final1"], pad=1, act="relu")
    m = conv(m, p["final2"], pad=1, act="relu")
    main_out = conv1x1_jax(m, p["final3"]["w"], p["final3"]["b"])

    dtl = conv(dtl, p["detail1"], pad=1, act="relu")
    detail_out = conv1x1_jax(dtl, p["detail2"]["w"], p["detail2"]["b"])

    e = edge_fwd(u4, p["edge_detail"]["edge"])
    e = conv(e, p["edge_detail"]["c1"], pad=1, act="relu")
    edge_out = conv1x1_jax(e, p["edge_detail"]["c2"]["w"], p["edge_detail"]["c2"]["b"])

    out = main_out + detail_out + edge_out * 0.5
    # spatial sizes always match the input here (pure x2 pool / x2 upsample),
    # so the reference's conditional F.interpolate branches are no-ops.
    return jnp.transpose(out, (0, 3, 1, 2)).astype(jnp.float32)  # back to NCHW


if __name__ == "__main__":
    x = jax.random.normal(jax.random.PRNGKey(0), (1, 1, 32, 32), jnp.float32)
    params = init_stressnet(in_ch=1, out_ch=1)
    out = stressnet_fwd(x, params)
    out = jax.block_until_ready(out)
    assert out.shape == (1, 1, 32, 32) and out.dtype == jnp.float32
    print("KERNEL_OK")
</pallas_src>

<mosaic_0001>
module attributes {stable_mosaic.version = 11 : i64} {
  func.func @kernel(%arg0: i32, %arg1: i32, %arg2: memref<256x128xbf16, #tpu.memory_space<vmem>>, %arg3: memref<128x128xbf16, #tpu.memory_space<vmem>>, %arg4: memref<1x128xf32, #tpu.memory_space<vmem>>, %arg5: memref<256x128xbf16, #tpu.memory_space<vmem>>) attributes {dimension_semantics = [#tpu.dimension_semantics<parallel>, #tpu.dimension_semantics<parallel>], iteration_bounds = array<i64: 4, 1>, scalar_prefetch = 0 : i64, scratch_operands = 0 : i64, tpu.core_type = #tpu.core_type<tc>, window_params = [{transform_indices = @transform_0, window_bounds = array<i64: 256, 128>}, {transform_indices = @transform_1, window_bounds = array<i64: 128, 128>}, {pipeline_mode = #tpu.pipeline_mode<synchronous>, transform_indices = @transform_2, window_bounds = array<i64: 1, 128>}, {transform_indices = @transform_3, window_bounds = array<i64: 256, 128>}]} {
    %c128_i32 = arith.constant 128 : i32
    %0 = arith.muli %arg1, %c128_i32 : i32
    %1 = tpu.assume_multiple %0, 128 : i32
    %c0 = arith.constant 0 : index
    %c0_0 = arith.constant 0 : index
    %2 = vector.load %arg2[%c0, %c0_0] : memref<256x128xbf16, #tpu.memory_space<vmem>>, vector<256x128xbf16>
    %c0_1 = arith.constant 0 : index
    %c0_2 = arith.constant 0 : index
    %3 = vector.load %arg3[%c0_1, %c0_2] : memref<128x128xbf16, #tpu.memory_space<vmem>>, vector<128x128xbf16>
    %cst = arith.constant dense<0.000000e+00> : vector<256x128xf32>
    %4 = tpu.matmul %2, %3, %cst {dimension_numbers = #tpu.dot_dimension_numbers<[1], [0], [0], [1], [0, 0, 1, 1], [], []>} : vector<256x128xbf16>, vector<128x128xbf16>, vector<256x128xf32> -> vector<256x128xf32>
    %c0_3 = arith.constant 0 : index
    %5 = arith.index_cast %1 : i32 to index
    %6 = vector.load %arg4[%c0_3, %5] : memref<1x128xf32, #tpu.memory_space<vmem>>, vector<1x128xf32>
    %7 = vector.broadcast %6 : vector<1x128xf32> to vector<256x128xf32>
    %8 = arith.addf %4, %7 : vector<256x128xf32>
    %9 = arith.truncf %8 : vector<256x128xf32> to vector<256x128xbf16>
    %c0_4 = arith.constant 0 : index
    %c0_5 = arith.constant 0 : index
    %10 = vector.load %arg5[%c0_4, %c0_5] : memref<256x128xbf16, #tpu.memory_space<vmem>>, vector<256x128xbf16>
    tpu.vector_store %arg5[%c0_4, %c0_5], %9 {strides = array<i32>} : memref<256x128xbf16, #tpu.memory_space<vmem>>, vector<256x128xbf16>,
    return
  }
  func.func @transform_0(%arg0: i32, %arg1: i32) -> (i32, i32) {
    %c0_i32 = arith.constant 0 : i32
    %c0_i32_0 = arith.constant 0 : i32
    return %arg0, %c0_i32 : i32, i32
  }
  func.func @transform_1(%arg0: i32, %arg1: i32) -> (i32, i32) {
    %c0_i32 = arith.constant 0 : i32
    %c0_i32_0 = arith.constant 0 : i32
    return %c0_i32, %arg1 : i32, i32
  }
  func.func @transform_2(%arg0: i32, %arg1: i32) -> (i32, i32) {
    %c0_i32 = arith.constant 0 : i32
    %c0_i32_0 = arith.constant 0 : i32
    %c0_i32_1 = arith.constant 0 : i32
    return %c0_i32, %c0_i32_0 : i32, i32
  }
  func.func @transform_3(%arg0: i32, %arg1: i32) -> (i32, i32) {
    %c0_i32 = arith.constant 0 : i32
    return %arg0, %arg1 : i32, i32
  }
}

</mosaic_0001>

<bundles_post_ra>
// kernel: matmul_fused.1
= control target key start
LH: loop header
LB: loop body
LE: loop exit
PB: predicated region body
PF: predicated region fallthrough
CT: control target
= control target key end

     0   :  { %s975_s12 = smov 0   ;;  %s977_s13 = smov 0   ;;  %s1115_s0 = inlined_call_operand.vmem [shape: bf16[1024,128], index: 0, kind: input, shape index: {}]   ;;  %s1116_s1 = inlined_call_operand.vmem [shape: bf16[128,128], index: 1, kind: input, shape index: {}]   ;;  %s1117_s2 = inlined_call_operand.vmem [shape: f32[1,128], index: 2, kind: input, shape index: {}]   ;;  %s1118_s3 = inlined_call_operand.vmem [shape: bf16[1024,128], index: 3, kind: output, shape index: {}]  }
   0x1   :  { %s979_s14 = smov 0  }
   0x2 LB: > { %s25_s15 = sadd.s32 1, %s949_s13  ;;  %p660_p0 = scmp.ge.s32.totalorder %s953_s14, 1  ;;  %s953_s14 = sphi %s979_s14, %s13_s14   ;;  %s949_s13 = sphi %s977_s13, %s1120_s13   ;;  %s945_s12 = sphi %s975_s12, %s1119_s12  }
   0x3   : > { %p27_p1 = scmp.ge.s32.totalorder %s25_s15, 4  ;;  %p161_p2 = scmp.lt.s32.totalorder %s953_s14, 5 }
   0x5   : > { %s1122_s15 = smov (%p27_p1, %s25_s15), 0  ;;  %p162_p3 = pnand %p660_p0, %p161_p2 }
   0x6   : > { %s661_s24 = sshll.u32 (!%p162_p3), %s945_s12, 5 }
   0x7   : > { %165 = sbr.rel (%p162_p3) target bundleno = 239 (0xef), region = 32  ;;  %p193_p4 = scmp.lt.s32.totalorder (!%p162_p3), %s661_s24, 127 }
   0xc   : > { %v786_v0 = vld [vmem:[%s1116_s1 + $0x38] sm:$0xff]  ;;  %v785_v1 = vld [vmem:[%s1116_s1 + $0x30] sm:$0xff]  ;;  %v784_v2 = vld [vmem:[%s1116_s1 + $0x28] sm:$0xff]  ;;  %s1124_s24 = smov (!%p193_p4, %s661_s24), 127 }
   0xd   : > { %411 = vmatpush.bf16.msra.mxu0 %v786_v0  ;;  %882 = vmatpush.bf16.msra.mxu1 %v786_v0  ;;  %v783_v3 = vld [vmem:[%s1116_s1 + $0x20] sm:$0xff]  ;;  %v782_v4 = vld [vmem:[%s1116_s1 + $0x18] sm:$0xff]  ;;  %v781_v5 = vld [vmem:[%s1116_s1 + $0x10] sm:$0xff]  ;;  %s662_s4 = sshll.u32 %s1124_s24, 2 }
   0xe   : > { %883 = vmatpush.bf16.msra.mxu2 %v786_v0  ;;  %884 = vmatpush.bf16.msra.mxu3 %v786_v0  ;;  %v780_v6 = vld [vmem:[%s1116_s1 + $0x8] sm:$0xff]  ;;  %v779_v7 = vld [vmem:[%s1116_s1] sm:$0xff]  ;;  %s1028_s9 = scalar_lea.vmem %s1115_s0, %s662_s4  ;;  %s1060_s17 = scalar_lea.vmem %s1118_s3, %s662_s4 }
   0xf   : > { %v763_v8 = vld [vmem:[%s1028_s9] sm:$0xff]  ;;  %v764_v12 = vld [vmem:[%s1028_s9 + $0x8] sm:$0xff]  ;;  %v765_v16 = vld [vmem:[%s1028_s9 + $0x10] sm:$0xff] }
  0x10   : > { %v767_v9 = vld [vmem:[%s1028_s9 + $0x20] sm:$0xff]  ;;  %v768_v13 = vld [vmem:[%s1028_s9 + $0x28] sm:$0xff]  ;;  %v769_v17 = vld [vmem:[%s1028_s9 + $0x30] sm:$0xff] }
  0x11   : > { %412 = vmatpush.bf16.msra.mxu0 %v785_v1  ;;  %885 = vmatpush.bf16.msra.mxu1 %v785_v1  ;;  %v771_v10 = vld [vmem:[%s1028_s9 + $0x40] sm:$0xff]  ;;  %v772_v14 = vld [vmem:[%s1028_s9 + $0x48] sm:$0xff]  ;;  %v773_v18 = vld [vmem:[%s1028_s9 + $0x50] sm:$0xff] }
  0x12   : > { %886 = vmatpush.bf16.msra.mxu2 %v785_v1  ;;  %887 = vmatpush.bf16.msra.mxu3 %v785_v1  ;;  %v775_v11 = vld [vmem:[%s1028_s9 + $0x60] sm:$0xff]  ;;  %v776_v15 = vld [vmem:[%s1028_s9 + $0x68] sm:$0xff]  ;;  %v777_v19 = vld [vmem:[%s1028_s9 + $0x70] sm:$0xff] }
  0x13   : > { %v766_v20 = vld [vmem:[%s1028_s9 + $0x18] sm:$0xff]  ;;  %v1049_v26 = vld [vmem:[%s1117_s2] ss:$0 sm:$0xff] }
  0x14   : > { %v770_v21 = vld [vmem:[%s1028_s9 + $0x38] sm:$0xff] }
  0x15   : > { %413 = vmatpush.bf16.msra.mxu0 %v784_v2  ;;  %888 = vmatpush.bf16.msra.mxu1 %v784_v2  ;;  %v774_v22 = vld [vmem:[%s1028_s9 + $0x58] sm:$0xff] }
  0x16   : > { %889 = vmatpush.bf16.msra.mxu2 %v784_v2  ;;  %890 = vmatpush.bf16.msra.mxu3 %v784_v2  ;;  %v778_v23 = vld [vmem:[%s1028_s9 + $0x78] sm:$0xff] }
  0x19   : > { %414 = vmatpush.bf16.msra.mxu0 %v783_v3  ;;  %891 = vmatpush.bf16.msra.mxu1 %v783_v3 }
  0x1a   : > { %892 = vmatpush.bf16.msra.mxu2 %v783_v3  ;;  %893 = vmatpush.bf16.msra.mxu3 %v783_v3 }
  0x1d   : > { %415 = vmatpush.bf16.msra.mxu0 %v782_v4  ;;  %894 = vmatpush.bf16.msra.mxu1 %v782_v4 }
  0x1e   : > { %895 = vmatpush.bf16.msra.mxu2 %v782_v4  ;;  %896 = vmatpush.bf16.msra.mxu3 %v782_v4 }
  0x21   : > { %416 = vmatpush.bf16.msra.mxu0 %v781_v5  ;;  %897 = vmatpush.bf16.msra.mxu1 %v781_v5 }
  0x22   : > { %898 = vmatpush.bf16.msra.mxu2 %v781_v5  ;;  %899 = vmatpush.bf16.msra.mxu3 %v781_v5 }
  0x25   : > { %417 = vmatpush.bf16.msra.mxu0 %v780_v6  ;;  %900 = vmatpush.bf16.msra.mxu1 %v780_v6 }
  0x26   : > { %901 = vmatpush.bf16.msra.mxu2 %v780_v6  ;;  %902 = vmatpush.bf16.msra.mxu3 %v780_v6 }
  0x29   : > { %418 = vmatpush.bf16.msra.mxu0 %v779_v7  ;;  %903 = vmatpush.bf16.msra.mxu1 %v779_v7 }
  0x2a   : > { %904 = vmatpush.bf16.msra.mxu2 %v779_v7  ;;  %905 = vmatpush.bf16.msra.mxu3 %v779_v7 }
  0x2c   : > { %419 = vmatmul.bf16.vlgmr.msra.gmra.mxu0 %v763_v8  ;;  %439 = vmatmul.bf16.vlgmr.msra.gmra.mxu1 %v767_v9 }
  0x2d   : > { %459 = vmatmul.bf16.vlgmr.msra.gmra.mxu2 %v771_v10  ;;  %479 = vmatmul.bf16.vlgmr.msra.gmra.mxu3 %v775_v11 }
  0x3c   : > { %424 = vmatmul.bf16.gmra.mxu0 %v764_v12  ;;  %444 = vmatmul.bf16.gmra.mxu1 %v768_v13 }
  0x3d   : > { %464 = vmatmul.bf16.gmra.mxu2 %v772_v14  ;;  %484 = vmatmul.bf16.gmra.mxu3 %v776_v15 }
  0x4c   : > { %429 = vmatmul.bf16.gmra.mxu0 %v765_v16  ;;  %449 = vmatmul.bf16.gmra.mxu1 %v769_v17 }
  0x4d   : > { %469 = vmatmul.bf16.gmra.mxu2 %v773_v18  ;;  %489 = vmatmul.bf16.gmra.mxu3 %v777_v19 }
  0x5c   : > { %434 = vmatmul.bf16.gmra.mxu0 %v766_v20  ;;  %454 = vmatmul.bf16.gmra.mxu1 %v770_v21 }
  0x5d   : > { %474 = vmatmul.bf16.gmra.mxu2 %v774_v22  ;;  %494 = vmatmul.bf16.gmra.mxu3 %v778_v23 }
  0xa9   : > { %v420_v24 = vpop.f32.mrf.mxu0  ;;  %v440_v25 = vpop.f32.mrf.mxu1 }
  0xaa   : > { %v421_v31 = vadd.f32 %v1049_v26, %v420_v24  ;;  %v441_v32 = vadd.f32 %v1049_v26, %v440_v25 }
  0xb0   : > { %v460_v27 = vpop.f32.mrf.mxu2  ;;  %v480_v28 = vpop.f32.mrf.mxu3 }
  0xb1   : > { %v422_v29 = vpop.f32.mrf.mxu0  ;;  %v442_v30 = vpop.f32.mrf.mxu1  ;;  %v461_v39 = vadd.f32 %v1049_v26, %v460_v27  ;;  %v481_v40 = vadd.f32 %v1049_v26, %v480_v28 }
  0xb2   : > { %v423_v33 = vadd.f32 %v1049_v26, %v422_v29  ;;  %v443_v34 = vadd.f32 %v1049_v26, %v442_v30 }
  0xb4   : > { %v790_v35 = vpack.c.bf16 %v423_v33, %v421_v31  ;;  %v810_v36 = vpack.c.bf16 %v443_v34, %v441_v32 }
  0xb6   : > { %791 = vst [vmem:[%s1060_s17] sm:$0xff] %v790_v35  }
  0xb7   : > { %870 = vst [vmem:[%s1060_s17 + $0x20] sm:$0xff] %v810_v36  }
  0xb8   : > { %v462_v37 = vpop.f32.mrf.mxu2  ;;  %v482_v38 = vpop.f32.mrf.mxu3 }
  0xb9   : > { %v463_v41 = vadd.f32 %v1049_v26, %v462_v37  ;;  %v483_v42 = vadd.f32 %v1049_v26, %v482_v38  ;;  %v425_v43 = vpop.f32.mrf.mxu0  ;;  %v445_v44 = vpop.f32.mrf.mxu1 }
  0xba   : > { %v426_v51 = vadd.f32 %v1049_v26, %v425_v43  ;;  %v446_v52 = vadd.f32 %v1049_v26, %v445_v44 }
  0xbb   : > { %v830_v45 = vpack.c.bf16 %v463_v41, %v461_v39  ;;  %v850_v46 = vpack.c.bf16 %v483_v42, %v481_v40 }
  0xbd   : > { %874 = vst [vmem:[%s1060_s17 + $0x40] sm:$0xff] %v830_v45  }
  0xbe   : > { %878 = vst [vmem:[%s1060_s17 + $0x60] sm:$0xff] %v850_v46  }
  0xc0   : > { %v465_v47 = vpop.f32.mrf.mxu2  ;;  %v485_v48 = vpop.f32.mrf.mxu3 }
  0xc1   : > { %v427_v49 = vpop.f32.mrf.mxu0  ;;  %v447_v50 = vpop.f32.mrf.mxu1  ;;  %v466_v59 = vadd.f32 %v1049_v26, %v465_v47  ;;  %v486_v60 = vadd.f32 %v1049_v26, %v485_v48 }
  0xc2   : > { %v428_v53 = vadd.f32 %v1049_v26, %v427_v49  ;;  %v448_v54 = vadd.f32 %v1049_v26, %v447_v50 }
  0xc4   : > { %v795_v55 = vpack.c.bf16 %v428_v53, %v426_v51  ;;  %v815_v56 = vpack.c.bf16 %v448_v54, %v446_v52 }
  0xc6   : > { %867 = vst [vmem:[%s1060_s17 + $0x8] sm:$0xff] %v795_v55  }
  0xc7   : > { %871 = vst [vmem:[%s1060_s17 + $0x28] sm:$0xff] %v815_v56  }
  0xc8   : > { %v467_v57 = vpop.f32.mrf.mxu2  ;;  %v487_v58 = vpop.f32.mrf.mxu3 }
  0xc9   : > { %v468_v61 = vadd.f32 %v1049_v26, %v467_v57  ;;  %v488_v62 = vadd.f32 %v1049_v26, %v487_v58  ;;  %v430_v63 = vpop.f32.mrf.mxu0  ;;  %v450_v0 = vpop.f32.mrf.mxu1 }
  0xca   : > { %v431_v7 = vadd.f32 %v1049_v26, %v430_v63  ;;  %v451_v8 = vadd.f32 %v1049_v26, %v450_v0 }
  0xcb   : > { %v835_v1 = vpack.c.bf16 %v468_v61, %v466_v59  ;;  %v855_v2 = vpack.c.bf16 %v488_v62, %v486_v60 }
  0xcd   : > { %875 = vst [vmem:[%s1060_s17 + $0x48] sm:$0xff] %v835_v1  }
  0xce   : > { %879 = vst [vmem:[%s1060_s17 + $0x68] sm:$0xff] %v855_v2  }
  0xd0   : > { %v470_v3 = vpop.f32.mrf.mxu2  ;;  %v490_v4 = vpop.f32.mrf.mxu3 }
  0xd1   : > { %v432_v5 = vpop.f32.mrf.mxu0  ;;  %v452_v6 = vpop.f32.mrf.mxu1  ;;  %v471_v15 = vadd.f32 %v1049_v26, %v470_v3  ;;  %v491_v16 = vadd.f32 %v1049_v26, %v490_v4 }
  0xd2   : > { %v433_v9 = vadd.f32 %v1049_v26, %v432_v5  ;;  %v453_v10 = vadd.f32 %v1049_v26, %v452_v6 }
  0xd4   : > { %v800_v11 = vpack.c.bf16 %v433_v9, %v431_v7  ;;  %v820_v12 = vpack.c.bf16 %v453_v10, %v451_v8 }
  0xd6   : > { %868 = vst [vmem:[%s1060_s17 + $0x10] sm:$0xff] %v800_v11  }
  0xd7   : > { %872 = vst [vmem:[%s1060_s17 + $0x30] sm:$0xff] %v820_v12  }
  0xd8   : > { %v472_v13 = vpop.f32.mrf.mxu2  ;;  %v492_v14 = vpop.f32.mrf.mxu3 }
  0xd9   : > { %v473_v17 = vadd.f32 %v1049_v26, %v472_v13  ;;  %v493_v18 = vadd.f32 %v1049_v26, %v492_v14  ;;  %v435_v19 = vpop.f32.mrf.mxu0  ;;  %v455_v20 = vpop.f32.mrf.mxu1 }
  0xda   : > { %v436_v28 = vadd.f32 %v1049_v26, %v435_v19  ;;  %v456_v29 = vadd.f32 %v1049_v26, %v455_v20 }
  0xdb   : > { %v840_v21 = vpack.c.bf16 %v473_v17, %v471_v15  ;;  %v860_v22 = vpack.c.bf16 %v493_v18, %v491_v16 }
  0xdd   : > { %876 = vst [vmem:[%s1060_s17 + $0x50] sm:$0xff] %v840_v21  }
  0xde   : > { %880 = vst [vmem:[%s1060_s17 + $0x70] sm:$0xff] %v860_v22  }
  0xe0   : > { %v475_v23 = vpop.f32.mrf.mxu2  ;;  %v495_v24 = vpop.f32.mrf.mxu3 }
  0xe1   : > { %v437_v25 = vpop.f32.mrf.mxu0  ;;  %v457_v27 = vpop.f32.mrf.mxu1  ;;  %v476_v36 = vadd.f32 %v1049_v26, %v475_v23  ;;  %v496_v37 = vadd.f32 %v1049_v26, %v495_v24 }
  0xe2   : > { %v438_v30 = vadd.f32 %v1049_v26, %v437_v25  ;;  %v458_v31 = vadd.f32 %v1049_v26, %v457_v27 }
  0xe4   : > { %v805_v32 = vpack.c.bf16 %v438_v30, %v436_v28  ;;  %v825_v33 = vpack.c.bf16 %v458_v31, %v456_v29 }
  0xe6   : > { %869 = vst [vmem:[%s1060_s17 + $0x18] sm:$0xff] %v805_v32  }
  0xe7   : > { %873 = vst [vmem:[%s1060_s17 + $0x38] sm:$0xff] %v825_v33  }
  0xe8   : > { %v477_v34 = vpop.f32.mrf.mxu2  ;;  %v497_v35 = vpop.f32.mrf.mxu3 }
  0xe9   : > { %v478_v38 = vadd.f32 %v1049_v26, %v477_v34  ;;  %v498_v39 = vadd.f32 %v1049_v26, %v497_v35 }
  0xeb   : > { %v845_v40 = vpack.c.bf16 %v478_v38, %v476_v36  ;;  %v865_v41 = vpack.c.bf16 %v498_v39, %v496_v37 }
  0xed   : > { %877 = vst [vmem:[%s1060_s17 + $0x58] sm:$0xff] %v845_v40  }
  0xee   : > { %881 = vst [vmem:[%s1060_s17 + $0x78] sm:$0xff] %v865_v41  }
  0xef PF: > { %s13_s14 = sadd.s32 1, %s953_s14   ;;  %s1119_s12 = smov %s949_s13 }
  0xf0   : > { %p10_p5 = scmp.ge.s32.totalorder %s13_s14, 6   ;;  %s1120_s13 = smov %s1122_s15 }
  0xf2   :  { %12 = sbr.rel (!%p10_p5) target bundleno = 2 (0x2), region = 66 }

</bundles_post_ra>
